<compile_context>
chip_gen: v6e
topology: v6e:2x2x1
jax: 0.10.0
libtpu: 0.0.40
codegen_flags: <defaults>
</compile_context>

<pallas_src>
import jax
import jax.numpy as jnp
import numpy as np
from jax.experimental import pallas as pl
from jax.experimental.pallas import tpu as pltpu


# ----------------------------- Pallas kernel -----------------------------

def matfact_kernel(u_ref,       # VMEM (tb, K)  compute_dtype — gathered user rows
                   cxT_ref,     # VMEM (K, tm)  compute_dtype — pre-transposed cx
                   ubias_ref,   # VMEM (tb, 1)  f32
                   cbias_ref,   # VMEM (1, tm)  f32  (cx_bias + offset folded)
                   out_ref):    # VMEM (tb, tm) f32
    prod = jnp.dot(u_ref[...], cxT_ref[...],
                   preferred_element_type=jnp.float32)        # (tb, tm) MXU
    out_ref[...] = (prod + ubias_ref[...] + cbias_ref[...]).astype(out_ref.dtype)


def _round_up(x, m):
    return ((x + m - 1) // m) * m


def matfact_pallas(user_emb, user_bias, cx_emb, cx_bias, offset_t,
                   *, tb=256, tm=1024, compute_dtype=jnp.float32):
    """user_emb (B,K), user_bias (B,), cx_emb (M,K), cx_bias (M,),
    offset_t (1,). Returns (B, M) f32."""
    B, K = user_emb.shape
    M = cx_emb.shape[0]

    # Pad to full, lane-dense tiles (8-multiple sublanes, 128-multiple lanes)
    # so every grid block is full-extent (no masked tail stores).
    B_pad = _round_up(B, 8)
    M_pad = _round_up(M, 128)
    tb = min(tb, B_pad)
    tm = min(tm, M_pad)
    B_pad = _round_up(B_pad, tb)
    M_pad = _round_up(M_pad, tm)
    grid = (B_pad // tb, M_pad // tm)

    # Wrapper-side layout prep (tiny O(B*K) / O(M*K) work; no full-table copies).
    u_p = jnp.zeros((B_pad, K), compute_dtype).at[:B, :].set(
        user_emb.astype(compute_dtype))
    ubias_p = jnp.zeros((B_pad, 1), jnp.float32).at[:B, 0].set(
        user_bias.astype(jnp.float32))
    # Pre-transpose context to (K, M_pad): MXU-native (tb,K) x (K,tm) matmul.
    cxT_p = jnp.zeros((K, M_pad), compute_dtype).at[:, :M].set(
        cx_emb.T.astype(compute_dtype))
    # Fold offset into the context-bias row (padded columns are sliced away).
    cbias_p = jnp.zeros((1, M_pad), jnp.float32).at[0, :M].set(
        cx_bias.astype(jnp.float32) + offset_t.reshape(()).astype(jnp.float32))

    itemsize = jnp.dtype(compute_dtype).itemsize
    cost = pl.CostEstimate(
        flops=2 * B_pad * M_pad * K,
        transcendentals=0,
        bytes_accessed=(B_pad * K * itemsize + M_pad * K * itemsize
                        + B_pad * M_pad * 4 + (B_pad + M_pad) * 4))

    out = pl.pallas_call(
        matfact_kernel,
        out_shape=jax.ShapeDtypeStruct((B_pad, M_pad), jnp.float32),
        grid_spec=pltpu.PrefetchScalarGridSpec(
            num_scalar_prefetch=0,
            grid=grid,
            in_specs=[
                pl.BlockSpec((tb, K), lambda i, j: (i, 0)),   # user rows
                pl.BlockSpec((K, tm), lambda i, j: (0, j)),   # cx^T
                pl.BlockSpec((tb, 1), lambda i, j: (i, 0)),   # user bias
                pl.BlockSpec((1, tm), lambda i, j: (0, j)),   # cx bias (+offset)
            ],
            out_specs=pl.BlockSpec((tb, tm), lambda i, j: (i, j)),
        ),
        compiler_params=pltpu.CompilerParams(
            # No cross-step scratch dependence: both axes independent, so the
            # v7x megacore may shard on whichever axis has blocks.
            dimension_semantics=("parallel", "parallel"),
            vmem_limit_bytes=64 << 20),
        cost_estimate=cost,
    )(u_p, cxT_p, ubias_p, cbias_p)

    return out[:B, :M]


# ----------------------------- Module glue -------------------------------

def init_matfact_params(key, N, M, D, K, T):
    """Deterministic init mirroring MatFact.__init__ (uniform(0, 0.05) on
    U/W/V, zeros for biases and offset)."""
    kU, kW, kV = jax.random.split(key, 3)
    return {
        "U": jax.random.uniform(kU, (T, N, K), jnp.float32, 0.0, 0.05),
        "W": jax.random.uniform(kW, (T, D, K), jnp.float32, 0.0, 0.05),
        "V": jax.random.uniform(kV, (T, M, K), jnp.float32, 0.0, 0.05),
        "U_bias": jnp.zeros((T, N), jnp.float32),
        "V_bias": jnp.zeros((T, M), jnp.float32),
        "W_bias": jnp.zeros((T, D), jnp.float32),
        "offset": jnp.zeros((T, 1), jnp.float32),
    }


def matfact_forward(params, t, user_ind, source, *, compute_dtype=jnp.float32,
                    tb=256, tm=1024):
    src = source[0]
    if src == "A":
        cx_emb, cx_bias = params["V"][t], params["V_bias"][t]
    elif src == "C":
        cx_emb, cx_bias = params["W"][t], params["W_bias"][t]
    else:
        raise ValueError(f"Invalid source: {source}. Expected 'A' or 'C'.")

    # Small O(B*K) gathers in the wrapper (cheaper than per-row in-kernel DMA);
    # only the gathered rows are (optionally) cast — the table is untouched.
    user_emb = params["U"][t][user_ind]          # (B, K)
    user_bias = params["U_bias"][t][user_ind]    # (B,)
    offset_t = params["offset"][t]               # (1,)

    # Note: torch's .squeeze() would drop size-1 dims; we always return (B, M).
    return matfact_pallas(user_emb, user_bias, cx_emb, cx_bias, offset_t,
                          tb=tb, tm=tm, compute_dtype=compute_dtype)


def matfact_forward_ref(params, t, user_ind, source):
    """Pure-JAX reference of the PyTorch forward."""
    src = source[0]
    if src == "A":
        cx_emb, cx_bias = params["V"][t], params["V_bias"][t]
    else:
        cx_emb, cx_bias = params["W"][t], params["W_bias"][t]
    user_emb = params["U"][t][user_ind]          # (B, K)
    user_bias = params["U_bias"][t][user_ind]    # (B,)
    prod = jnp.einsum("mk,bk->bm", cx_emb, user_emb)
    return prod + user_bias[:, None] + cx_bias[None, :] + params["offset"][t]


# --------------------------------- main -----------------------------------

if __name__ == "__main__":
    # Small shapes consistent with the module: T timesteps, N users,
    # M items (source 'A'), D items (source 'C'), K latent dims.
    T, N, M, D, K = 3, 8, 16, 12, 32
    key = jax.random.PRNGKey(0)
    kp, ki = jax.random.split(key)

    params = init_matfact_params(kp, N, M, D, K, T)

    t = 1
    user_ind = jax.random.randint(ki, (4,), 0, N)   # batch of 4 user indices

    # Source 'A' path, f32 operands (exact vs reference).
    out_a = jax.block_until_ready(matfact_forward(params, t, user_ind, "A"))
    ref_a = matfact_forward_ref(params, t, user_ind, "A")
    np.testing.assert_allclose(np.asarray(out_a), np.asarray(ref_a),
                               rtol=1e-5, atol=1e-5)

    # Source 'C' path.
    out_c = jax.block_until_ready(matfact_forward(params, t, user_ind, "C"))
    ref_c = matfact_forward_ref(params, t, user_ind, "C")
    np.testing.assert_allclose(np.asarray(out_c), np.asarray(ref_c),
                               rtol=1e-5, atol=1e-5)

    # bf16-operand path (v6e/v7x MXU rate), f32 accumulation.
    out_bf = jax.block_until_ready(
        matfact_forward(params, t, user_ind, "A", compute_dtype=jnp.bfloat16))
    np.testing.assert_allclose(np.asarray(out_bf), np.asarray(ref_a),
                               rtol=2e-2, atol=2e-2)

    print("KERNEL_OK")
</pallas_src>

<mosaic_0001>
module attributes {stable_mosaic.version = 11 : i64} {
  func.func @matfact_kernel(%arg0: i32, %arg1: i32, %arg2: memref<8x32xf32, #tpu.memory_space<vmem>>, %arg3: memref<32x128xf32, #tpu.memory_space<vmem>>, %arg4: memref<8x1xf32, #tpu.memory_space<vmem>>, %arg5: memref<1x128xf32, #tpu.memory_space<vmem>>, %arg6: memref<8x128xf32, #tpu.memory_space<vmem>>) attributes {dimension_semantics = [#tpu.dimension_semantics<parallel>, #tpu.dimension_semantics<parallel>], iteration_bounds = array<i64: 1, 1>, scalar_prefetch = 0 : i64, scratch_operands = 0 : i64, tpu.core_type = #tpu.core_type<tc>, window_params = [{transform_indices = @transform_0, window_bounds = array<i64: 8, 32>}, {transform_indices = @transform_1, window_bounds = array<i64: 32, 128>}, {transform_indices = @transform_2, window_bounds = array<i64: 8, 1>}, {transform_indices = @transform_3, window_bounds = array<i64: 1, 128>}, {transform_indices = @transform_4, window_bounds = array<i64: 8, 128>}]} {
    %c0 = arith.constant 0 : index
    %c0_0 = arith.constant 0 : index
    %0 = vector.load %arg2[%c0, %c0_0] : memref<8x32xf32, #tpu.memory_space<vmem>>, vector<8x32xf32>
    %c0_1 = arith.constant 0 : index
    %c0_2 = arith.constant 0 : index
    %1 = vector.load %arg3[%c0_1, %c0_2] : memref<32x128xf32, #tpu.memory_space<vmem>>, vector<32x128xf32>
    %cst = arith.constant dense<0.000000e+00> : vector<8x128xf32>
    %2 = tpu.matmul %0, %1, %cst {dimension_numbers = #tpu.dot_dimension_numbers<[1], [0], [0], [1], [0, 0, 1, 1], [], []>} : vector<8x32xf32>, vector<32x128xf32>, vector<8x128xf32> -> vector<8x128xf32>
    %c0_3 = arith.constant 0 : index
    %c0_4 = arith.constant 0 : index
    %3 = vector.load %arg4[%c0_3, %c0_4] : memref<8x1xf32, #tpu.memory_space<vmem>>, vector<8x1xf32>
    %4 = vector.broadcast %3 : vector<8x1xf32> to vector<8x128xf32>
    %5 = arith.addf %2, %4 : vector<8x128xf32>
    %c0_5 = arith.constant 0 : index
    %c0_6 = arith.constant 0 : index
    %6 = vector.load %arg5[%c0_5, %c0_6] : memref<1x128xf32, #tpu.memory_space<vmem>>, vector<1x128xf32>
    %7 = vector.broadcast %6 : vector<1x128xf32> to vector<8x128xf32>
    %8 = arith.addf %5, %7 : vector<8x128xf32>
    %c0_7 = arith.constant 0 : index
    %c0_8 = arith.constant 0 : index
    %9 = vector.load %arg6[%c0_7, %c0_8] : memref<8x128xf32, #tpu.memory_space<vmem>>, vector<8x128xf32>
    tpu.vector_store %arg6[%c0_7, %c0_8], %8 {strides = array<i32>} : memref<8x128xf32, #tpu.memory_space<vmem>>, vector<8x128xf32>,
    return
  }
  func.func @transform_0(%arg0: i32, %arg1: i32) -> (i32, i32) {
    %c0_i32 = arith.constant 0 : i32
    %c0_i32_0 = arith.constant 0 : i32
    return %arg0, %c0_i32 : i32, i32
  }
  func.func @transform_1(%arg0: i32, %arg1: i32) -> (i32, i32) {
    %c0_i32 = arith.constant 0 : i32
    %c0_i32_0 = arith.constant 0 : i32
    return %c0_i32, %arg1 : i32, i32
  }
  func.func @transform_2(%arg0: i32, %arg1: i32) -> (i32, i32) {
    %c0_i32 = arith.constant 0 : i32
    %c0_i32_0 = arith.constant 0 : i32
    return %arg0, %c0_i32 : i32, i32
  }
  func.func @transform_3(%arg0: i32, %arg1: i32) -> (i32, i32) {
    %c0_i32 = arith.constant 0 : i32
    %c0_i32_0 = arith.constant 0 : i32
    return %c0_i32, %arg1 : i32, i32
  }
  func.func @transform_4(%arg0: i32, %arg1: i32) -> (i32, i32) {
    %c0_i32 = arith.constant 0 : i32
    return %arg0, %arg1 : i32, i32
  }
}

</mosaic_0001>

<bundles_post_ra>
// kernel: tpu_custom_call.1
= control target key start
LH: loop header
LB: loop body
LE: loop exit
PB: predicated region body
PF: predicated region fallthrough
CT: control target
= control target key end

     0   :  { %9 = vsyncpa [#allocation3], 0  ;;  %s258_s0 = inlined_call_operand.vmem [shape: f32[8,32], index: 0, kind: input, shape index: {}]   ;;  %s259_s1 = inlined_call_operand.hbm [shape: f32[32,128], index: 1, kind: input, shape index: {}]   ;;  %s260_s2 = inlined_call_operand.vmem [shape: f32[8,1], index: 2, kind: input, shape index: {}]   ;;  %s261_s3 = inlined_call_operand.vmem [shape: f32[1,128], index: 3, kind: input, shape index: {}]   ;;  %s262_s4 = inlined_call_operand.hbm [shape: f32[8,128], index: 4, kind: output, shape index: {}]  }
   0x1   :  { %10 = vsyncpa [#allocation4], 0  ;;  %s211_s15 = smov [#allocation2]  }
   0x2   :  { %s18_s16 = sshll.u32 %s211_s15, 4  ;;  %s19_s16 = int_to_ptr.vmem [resolvable:$true] %s18_s16 }
   0x3   :  { %s175_s17 = scalar_lea.vmem %s19_s16, 512  ;;  %p180_p1 = scmp.lt.s32.totalorder %s19_s16, %s19_s16 }
   0x4   :  { %p176_p0 = scmp.ne.s32.totalorder %s19_s16, %s175_s17  ;;  %p181_p2 = scmp.lt.s32.totalorder %s175_s17, %s175_s17 }
   0x6   :  { %p182_p3 = por %p181_p2, %p180_p1 }
   0x8   :  { %p183_p4 = pnand %p182_p3, %p176_p0 }
   0xa   :  { %186 = shalt.err (!%p183_p4)
}
   0xb   :  { %s212_s18 = smov 128   ;;  %s213_s19 = smov 8  }
   0xc   :  { %24 = dma.hbm_to_vmem [thread:$0]  %s259_s1, 512, %s19_s16, [#allocation3], %s212_s18, %s212_s18, %s213_s19  }
   0xd   :  { %207 = dma.done.wait [#allocation3], 512  }
   0xe   :  { %208 = vsyncadd [#allocation3], 4294966784  ;;  %v214_v0 = vmov 0.0   ;;  %vm215_vm0 = vmmov 0   ;;  %v216_v1 = vmov 0   ;;  %v36_v2 = vld [vmem:[#allocation2 + $0x18] sm:$0xff] }
   0xf   :  { %148 = vmatprep.subr.mxu0 %v214_v0  ;;  %156 = vmatprep.mubr.msk.f32.mxu0 %vm215_vm0, %v214_v0  ;;  %v35_v3 = vld [vmem:[#allocation2 + $0x10] sm:$0xff]  ;;  %v37_v4 = vld [vmem:[%s260_s2] sm:$0xff]  ;;  %v34_v5 = vld [vmem:[#allocation2 + $0x8] sm:$0xff]  ;;  %vm43_vm1 = vcmask 261120   ;;  %s217_s2 = smov [#allocation5]  }
  0x10   :  { %166 = vset.pattern.permute.xlu0 %v216_v1  ;;  %149 = vmatpush3.msra.mxu0 %v36_v2  ;;  %v33_v6 = vld [vmem:[#allocation2] sm:$0xff]  ;;  %s132_s27 = sshll.u32 %s217_s2, 4  ;;  %s133_s27 = int_to_ptr.vmem [resolvable:$true] %s132_s27 }
  0x11   :  { %150 = vmatprep.subr.mxu0 %v214_v0  ;;  %40 = vperm.xlu0 %166, %v37_v4   ;;  %v32_v7 = vld [vmem:[%s258_s0] sm:$0xff]  ;;  %s187_s28 = scalar_lea.vmem %s133_s27, 128  ;;  %p192_p6 = scmp.lt.s32.totalorder %s133_s27, %s133_s27 }
  0x12   :  { %151 = vmatpush3.msra.mxu0 %v35_v3  ;;  %v142_v10 = vld [vmem:[%s261_s3] ss:$0 sm:$0xff]  ;;  %p188_p5 = scmp.ne.s32.totalorder %s133_s27, %s187_s28  ;;  %p193_p7 = scmp.lt.s32.totalorder %s187_s28, %s187_s28 }
  0x13   :  { %152 = vmatprep.subr.mxu0 %v214_v0 }
  0x14   :  { %153 = vmatpush3.msra.mxu0 %v34_v5  ;;  %p194_p8 = por %p193_p7, %p192_p6 }
  0x15   :  { %154 = vmatprep.subr.mxu0 %v214_v0 }
  0x16   :  { %155 = vmatpush3.msra.mxu0 %v33_v6  ;;  %p195_p9 = pnand %p194_p8, %p188_p5 }
  0x17   :  { %157 = vmatmul.mubr.msk.f32.vlgmr.msra.gmra.mxu0 %vm43_vm1, %v32_v7 }
  0x8c   :  { %v41_v8 = vpop.permute.xlu0 %40 }
  0xd7   :  { %v113_v9 = vpop.f32.mrf.mxu0 }
  0xd8   :  { %v114_v11 = vadd.f32 %v113_v9, %v41_v8 }
  0xd9   :  { %v158_v12 = vpop.f32.mrf.mxu0 }
  0xda   :  { %v124_v13 = vadd.f32 %v142_v10, %v114_v11 }
  0xdc   :  { %125 = vst [vmem:[#allocation5] sm:$0xff] %v124_v13 }
  0xdd   :  { %198 = shalt.err (!%p195_p9)
}
  0xde   :  { %135 = dma.vmem_to_hbm [thread:$0]  %s133_s27, 128, %s262_s4, [#allocation4]  }
  0xdf   :  { %209 = dma.done.wait [#allocation4], 128  }
  0xe0   :  { %210 = vsyncadd [#allocation4], 4294967168 }
  0xe1   :  { %139 = vsyncpa [#allocation3], 1 }
  0xe2   :  { %140 = vsyncpa [#allocation4], 1 }

</bundles_post_ra>
